<compile_context>
chip_gen: v7x
topology: tpu7x:2x2x1
jax: 0.10.0
libtpu: 0.0.40
codegen_flags: <defaults>
</compile_context>

<pallas_src>
import jax
import jax.numpy as jnp
from jax.experimental import pallas as pl
from jax.experimental.pallas import tpu as pltpu


def _log_softmax_kernel(x_idx_ref, w_ref, o_ref):
    # w_ref: (1, ts, V) slab of weights for example x[i], seq tile s.
    # f32 accumulation regardless of the streamed dtype.  Lane reductions
    # (max/sum over axis=-1) go to the XLU, exp/log to the EUP, keeping VALU
    # and load/store slots free for the HBM stream.
    w = w_ref[...].astype(jnp.float32)
    m = jnp.max(w, axis=-1, keepdims=True)
    lse = jnp.log(jnp.sum(jnp.exp(w - m), axis=-1, keepdims=True))
    # Fused epilogue: no materialized `shifted` block.
    o_ref[...] = (w - (m + lse)).astype(o_ref.dtype)


def _sublane_multiple(dtype):
    # Min sublane tile for the second-to-last dim: f32 -> 8, bf16 -> 16,
    # int8/fp8 -> 32.
    itemsize = jnp.dtype(dtype).itemsize
    return max(8, 32 // max(1, itemsize))


def _pick_seq_tile(seq_len, vocab, itemsize, sublane, target_bytes):
    rows = target_bytes // max(1, vocab * itemsize)
    if rows >= seq_len:
        return seq_len                       # full dim: always a legal block
    rows = max(sublane, (rows // sublane) * sublane)
    # Prefer a tile that divides seq_len so the last tile isn't ragged
    # (ragged tails are correct — per-row math, padded rows never stored —
    # but force masked partial stores).
    for ts in range(rows, sublane - 1, -sublane):
        if seq_len % ts == 0:
            return ts
    return rows


def memorization_forward(weights, x, *, out_dtype=None,
                         target_block_bytes=4 * 1024 * 1024):
    """log_softmax(weights[x], axis=-1) via Pallas.

    weights: (num_examples, seq_len, vocab_size), f32 or bf16.
             (Store the table in bf16 to halve streamed HBM bytes; math is f32.)
    x:       (batch,) integer example indices
    returns: (batch, seq_len, vocab_size) in `out_dtype` (default weights.dtype)
    """
    num_examples, seq_len, vocab_size = weights.shape
    batch = x.shape[0]
    x = x.astype(jnp.int32)
    out_dtype = weights.dtype if out_dtype is None else out_dtype

    w_itemsize = jnp.dtype(weights.dtype).itemsize
    o_itemsize = jnp.dtype(out_dtype).itemsize
    sublane = _sublane_multiple(weights.dtype)

    ts = _pick_seq_tile(seq_len, vocab_size, w_itemsize, sublane,
                        target_block_bytes)
    seq_tiles = pl.cdiv(seq_len, ts)

    # VMEM budget: double-buffered in+out blocks plus ~2 block-sized f32
    # temporaries inside the kernel (f32 upcast copy + exp result).  Raise
    # above v5e's 16 MiB default scoped limit, cap at 48 MiB to stay inside
    # v7x's 64 MiB physical VMEM (v6e/v5e have 128 MiB and are unaffected).
    in_blk = ts * vocab_size * w_itemsize
    out_blk = ts * vocab_size * o_itemsize
    vmem_need = 2 * (in_blk + out_blk) + 2 * ts * vocab_size * 4 + (2 << 20)
    vmem_limit = int(min(max(vmem_need, 32 << 20), 48 << 20))

    n_elems = batch * seq_len * vocab_size
    cost = pl.CostEstimate(
        flops=5 * n_elems,                          # sub/max/add/sub per elem
        transcendentals=n_elems + batch * seq_len,  # exp per elem + log per row
        bytes_accessed=n_elems * (w_itemsize + o_itemsize),
    )

    grid_spec = pltpu.PrefetchScalarGridSpec(
        num_scalar_prefetch=1,
        grid=(batch, seq_tiles),
        in_specs=[
            # Gather: example-axis block index comes from the prefetched x.
            # Last dim is a full-dim block (== vocab_size), so no padding or
            # output slicing is ever needed.
            pl.BlockSpec((1, ts, vocab_size),
                         lambda i, s, x_ref: (x_ref[i], s, 0)),
        ],
        out_specs=pl.BlockSpec((1, ts, vocab_size),
                               lambda i, s, x_ref: (i, s, 0)),
    )

    return pl.pallas_call(
        _log_softmax_kernel,
        out_shape=jax.ShapeDtypeStruct((batch, seq_len, vocab_size), out_dtype),
        grid_spec=grid_spec,
        compiler_params=pltpu.CompilerParams(
            # Every (example, seq-tile) block is independent -> both axes
            # parallel; lets v7x shard the grid across its 2 TensorCores.
            dimension_semantics=("parallel", "parallel"),
            vmem_limit_bytes=vmem_limit),
        cost_estimate=cost,
    )(x, weights)


if __name__ == "__main__":
    key = jax.random.PRNGKey(0)
    k_w, k_x, k_w2, k_x2 = jax.random.split(key, 4)

    # Case 1: f32 table, lane-aligned vocab (matches the PyTorch module).
    num_examples, seq_len, vocab_size = 8, 8, 128
    batch = 2
    weights = jax.random.normal(k_w, (num_examples, seq_len, vocab_size),
                                dtype=jnp.float32)
    x = jax.random.randint(k_x, (batch,), 0, num_examples, dtype=jnp.int32)

    out = jax.block_until_ready(memorization_forward(weights, x))
    ref = jax.nn.log_softmax(weights[x], axis=-1)
    assert out.shape == (batch, seq_len, vocab_size)
    assert out.dtype == jnp.float32
    assert jnp.allclose(out, ref, atol=1e-5, rtol=1e-5)

    # Case 2: bf16 table, vocab not a multiple of 128 (no pad / no slice path),
    # bf16 output with f32 internal math.
    vocab2 = 96
    weights2 = jax.random.normal(
        k_w2, (num_examples, seq_len, vocab2), dtype=jnp.float32
    ).astype(jnp.bfloat16)
    x2 = jax.random.randint(k_x2, (batch,), 0, num_examples, dtype=jnp.int32)

    out2 = jax.block_until_ready(memorization_forward(weights2, x2))
    ref2 = jax.nn.log_softmax(weights2[x2].astype(jnp.float32), axis=-1)
    assert out2.shape == (batch, seq_len, vocab2)
    assert out2.dtype == jnp.bfloat16
    assert jnp.allclose(out2.astype(jnp.float32), ref2, atol=5e-2, rtol=5e-2)

    print("KERNEL_OK")
</pallas_src>

<mosaic_0001>
module attributes {stable_mosaic.version = 11 : i64} {
  func.func @_log_softmax_kernel(%arg0: i32, %arg1: i32, %arg2: memref<2xi32, #tpu.memory_space<smem>>, %arg3: memref<1x8x128xf32, #tpu.memory_space<vmem>>, %arg4: memref<1x8x128xf32, #tpu.memory_space<vmem>>) attributes {dimension_semantics = [#tpu.dimension_semantics<parallel>, #tpu.dimension_semantics<parallel>], iteration_bounds = array<i64: 2, 1>, scalar_prefetch = 1 : i64, scratch_operands = 0 : i64, tpu.core_type = #tpu.core_type<tc>, window_params = [{transform_indices = @transform_0, window_bounds = array<i64: 1, 8, 128>}, {transform_indices = @transform_1, window_bounds = array<i64: 1, 8, 128>}]} {
    %c0 = arith.constant 0 : index
    %c0_0 = arith.constant 0 : index
    %c0_1 = arith.constant 0 : index
    %0 = vector.load %arg3[%c0, %c0_0, %c0_1] : memref<1x8x128xf32, #tpu.memory_space<vmem>>, vector<1x8x128xf32>
    %cst = arith.constant dense<0xFF800000> : vector<1x8xf32>
    %1 = vector.multi_reduction <maximumf>, %0, %cst [2] : vector<1x8x128xf32> to vector<1x8xf32>
    %2 = vector.shape_cast %1 : vector<1x8xf32> to vector<1x8x1xf32>
    %3 = vector.broadcast %2 : vector<1x8x1xf32> to vector<1x8x128xf32>
    %4 = arith.subf %0, %3 : vector<1x8x128xf32>
    %5 = math.exp %4 : vector<1x8x128xf32>
    %cst_2 = arith.constant dense<0.000000e+00> : vector<1x8xf32>
    %6 = vector.multi_reduction <add>, %5, %cst_2 [2] : vector<1x8x128xf32> to vector<1x8xf32>
    %7 = vector.shape_cast %6 : vector<1x8xf32> to vector<1x8x1xf32>
    %8 = math.log %7 : vector<1x8x1xf32>
    %9 = arith.addf %2, %8 : vector<1x8x1xf32>
    %10 = vector.broadcast %9 : vector<1x8x1xf32> to vector<1x8x128xf32>
    %11 = arith.subf %0, %10 : vector<1x8x128xf32>
    %c0_3 = arith.constant 0 : index
    %c0_4 = arith.constant 0 : index
    %c0_5 = arith.constant 0 : index
    %12 = vector.load %arg4[%c0_3, %c0_4, %c0_5] : memref<1x8x128xf32, #tpu.memory_space<vmem>>, vector<1x8x128xf32>
    tpu.vector_store %arg4[%c0_3, %c0_4, %c0_5], %11 {strides = array<i32>} : memref<1x8x128xf32, #tpu.memory_space<vmem>>, vector<1x8x128xf32>,
    return
  }
  func.func @transform_0(%arg0: i32, %arg1: i32, %arg2: memref<2xi32, #tpu.memory_space<smem>>) -> (i32, i32, i32) {
    %0 = arith.index_cast %arg0 : i32 to index
    %1 = memref.load %arg2[%0] : memref<2xi32, #tpu.memory_space<smem>>
    %c0_i32 = arith.constant 0 : i32
    %c0_i32_0 = arith.constant 0 : i32
    return %1, %arg1, %c0_i32 : i32, i32, i32
  }
  func.func @transform_1(%arg0: i32, %arg1: i32, %arg2: memref<2xi32, #tpu.memory_space<smem>>) -> (i32, i32, i32) {
    %c0_i32 = arith.constant 0 : i32
    %c0_i32_0 = arith.constant 0 : i32
    return %arg0, %arg1, %c0_i32 : i32, i32, i32
  }
}

</mosaic_0001>

<bundles_post_ra>
// kernel: tpu_custom_call.1
= control target key start
LH: loop header
LB: loop body
LE: loop exit
PB: predicated region body
PF: predicated region fallthrough
CT: control target
= control target key end

     0   :  { %s759_s0 = inlined_call_operand.hbm [shape: s32[2], index: 0, kind: input, shape index: {}]   ;;  %s760_s1 = inlined_call_operand.hbm [shape: f32[8,8,128], index: 1, kind: input, shape index: {}]   ;;  %s761_s2 = inlined_call_operand.hbm [shape: f32[2,8,128], index: 2, kind: output, shape index: {}]  }
   0x1   :  { %s374_s11 = scalar_lea.hbm %s759_s0, 16 }
   0x2   :  { %p375_p0 = scmp.ne.s32.totalorder %s759_s0, %s374_s11  ;;  %p378_p1 = scmp.lt.u32.totalorder %s374_s11, %s759_s0 }
   0x4   :  { %p380_p2 = pnand %p378_p1, %p375_p0 }
   0x6   :  { %383 = shalt.err (!%p380_p2)  }
   0x7   :  { %s524_s16 = smov [#allocation3]  }
   0x8   :  { %8 = dma.hbm_to_smem %s759_s0, 16, %s524_s16, [#allocation2] }
   0x9   :  { %478 = dma.done.wait [#allocation2], 16 }
   0xa   :  { %479 = vsyncadd [#allocation2], 4294967280 }
   0xb   :  { %10 = sfence }
   0xc   :  { %11 = vsyncpa [#allocation5], 0 }
   0xd   :  { %13 = vsyncpa [#allocation5 + $0x1], 0 }
   0xe   :  { %14 = vsyncpa [#allocation6], 0 }
   0xf   :  { %16 = vsyncpa [#allocation6 + $0x1], 0  ;;  %s554_s19 = smov 0   ;;  %s556_s20 = smov 0  }
  0x10   :  { %s558_s21 = smov 0   ;;  %s560_s22 = smov 0  }
  0x11   :  { %s562_s23 = smov 0   ;;  %s564_s24 = smov 0  }
  0x12   :  { %s566_s0 = smov 0   ;;  %s568_s25 = smov 0  }
  0x13   :  { %s570_s26 = smov 0  }
  0x14 LB: > { %s266_s27 = sadd.s32 4294967295, %s522_s26   ;;  %s267_s28 = sadd.s32 4294967294, %s522_s26   ;;  %s522_s26 = sphi %s570_s26, %s22_s26   ;;  %s518_s25 = sphi %s568_s25, %s781_s25   ;;  %s514_s0 = sphi %s566_s0, %s780_s0   ;;  %s510_s24 = sphi %s564_s24, %s779_s24   ;;  %s506_s23 = sphi %s562_s23, %s778_s23   ;;  %s502_s22 = sphi %s560_s22, %s777_s22   ;;  %s498_s21 = sphi %s558_s21, %s776_s21   ;;  %s494_s20 = sphi %s556_s20, %s775_s20   ;;  %s490_s19 = sphi %s554_s19, %s774_s19  }
  0x15   : > { %s34_s29 = sadd.s32 1, %s518_s25  ;;  %s38_s30 = sld [smem:[#allocation3 + %s518_s25]] }
  0x16   : > { %p36_p3 = scmp.ge.s32.totalorder %s34_s29, 2  ;;  %s45_s3 = sadd.s32 1, %s510_s24 }
  0x17   : > { %p52_p4 = scmp.ne.s32.totalorder %s510_s24, %s506_s23  ;;  %p53_p5 = scmp.eq.s32.totalorder %s522_s26, 0 }
  0x18   : > { %s783_s29 = smov (%p36_p3, %s34_s29), 0  ;;  %p58_p7 = scmp.ne.s32.totalorder %s506_s23, %s502_s22 }
  0x19   : > { %p607_p6 = por %p53_p5, %p52_p4  ;;  %s39_s5 = sld [smem:[#allocation3 + %s783_s29]] }
  0x1a   : > { %p59_p8 = scmp.eq.s32.totalorder %s266_s27, 0  ;;  %s68_s6 = ssub.s32 %s518_s25, %s783_s29 }
  0x1b   : > { %s73_s7 = sadd.s32 1, %s498_s21  ;;  %p71_p10 = scmp.eq.s32.totalorder %s68_s6, 0 }
  0x1c   : > { %p616_p9 = por %p59_p8, %p58_p7  ;;  %p83_p11 = scmp.ne.s32.totalorder %s498_s21, %s494_s20 }
  0x1d   : > { %p84_p12 = scmp.eq.s32.totalorder %s266_s27, 1  ;;  %p89_p0 = scmp.ne.s32.totalorder %s494_s20, %s490_s19 }
  0x1e   : > { %s765_s8 = scalar_select %p616_p9, 1, 0 }
  0x1f   : > { %s623_s9 = scalar_select %p71_p10, %s498_s21, %s73_s7  }
  0x20   : > { %p625_p13 = por %p84_p12, %p83_p11  ;;  %s40_s11 = ssub.s32 %s38_s30, %s39_s5 }
  0x21   : > { %p90_p1 = scmp.eq.s32.totalorder %s267_s28, 1  ;;  %p43_p2 = scmp.eq.s32.totalorder %s40_s11, 0 }
  0x22   : > { %s766_s10 = scalar_select %p625_p13, 1, 0 }
  0x23   : > { %p632_p4 = por %p90_p1, %p89_p0  ;;  %p295_p5 = scmp.lt.s32.totalorder %s522_s26, 2 }
  0x24   : > { %s638_s13 = scalar_select %p43_p2, %s510_s24, %s45_s3  }
  0x25   : > { %s767_s12 = scalar_select %p632_p4, 1, 0 }
  0x26   : > { %s110_s14 = sand.u32 1, %s510_s24   ;;  %p643_p7 = pnand %p295_p5, %p607_p6 }
  0x27   : > { %s270_s16 = sshll.u32 %s110_s14, 3  ;;  %p272_p8 = scmp.ge.s32.totalorder %s522_s26, 1 }
  0x28   : > { %s279_s17 = scalar_select %p607_p6, [#allocation3], [#allocation8] }
  0x29   : > { %s280_s18 = scalar_select %p607_p6, %s518_s25, 0 }
  0x2a   : > { %s785_s17 = smov (!%p295_p5, %s279_s17), [#allocation9]  ;;  %p128_p10 = scmp.lt.s32.totalorder %s522_s26, 3 }
  0x2b   : > { %s787_s18 = smov (!%p295_p5, %s280_s18), 0  ;;  %s114_s27 = scalar_lea.vmem [#allocation4], %s270_s16 }
  0x2c   : > { %s115_s22 = sld [smem:[%s785_s17 + %s787_s18]]  ;;  %s123_s28 = sshll.u32 %s114_s27, 4  ;;  %s658_s28 = int_to_ptr.vmem [resolvable:$true] %s123_s28 }
  0x2d   : > { %p654_p11 = pnand %p272_p8, %p128_p10  ;;  %s111_s7 = scalar_lea.sflag [#allocation5], %s110_s14 }
  0x2e   : > { %p386_p12 = pneg %p643_p7  ;;  %s389_s18 = scalar_lea.hbm %s760_s1, 1024 }
  0x32   : > { %s271_s3 = sshll.u32 %s115_s22, 7 }
  0x33   : > { %s663_s4 = scalar_lea.hbm %s760_s1, %s271_s3 }
  0x34   : > { %s384_s11 = scalar_lea.hbm %s663_s4, 128  ;;  %p390_p2 = scmp.lt.u32.totalorder %s663_s4, %s760_s1 }
  0x35   : > { %p385_p6 = scmp.ne.s32.totalorder %s663_s4, %s384_s11  ;;  %p391_p5 = scmp.lt.u32.totalorder %s389_s18, %s384_s11 }
  0x36   : > { %p393_p10 = scmp.lt.u32.totalorder %s384_s11, %s663_s4 }
  0x37   : > { %p387_p0 = pnand %p386_p12, %p385_p6  ;;  %p392_p8 = por %p391_p5, %p390_p2 }
  0x39   : > { %p388_p1 = pneg %p387_p0  ;;  %p394_p3 = por %p393_p10, %p392_p8 }
  0x3b   : > { %p395_p4 = pnand %p394_p3, %p388_p1 }
  0x3d   : > { %398 = shalt.err (!%p395_p4)
}
  0x3e   : > { %s399_s14 = scalar_lea.vmem %s658_s28, 128  ;;  %s525_s3 = smov [#allocation4]  }
  0x3f   : > { %p400_p6 = scmp.ne.s32.totalorder %s658_s28, %s399_s14  ;;  %s404_s5 = sshll.u32 %s525_s3, 4  ;;  %s405_s5 = int_to_ptr.vmem [resolvable:$false] %s404_s5 }
  0x40   : > { %s406_s6 = scalar_lea.vmem %s405_s5, 256  ;;  %p407_p9 = scmp.lt.s32.totalorder %s658_s28, %s405_s5 }
  0x41   : > { %p402_p0 = pnand %p400_p6, %p386_p12  ;;  %p408_p2 = scmp.lt.s32.totalorder %s406_s6, %s399_s14 }
  0x43   : > { %p403_p13 = pneg %p402_p0  ;;  %p409_p5 = por %p408_p2, %p407_p9 }
  0x45   : > { %p410_p8 = pnand %p409_p5, %p403_p13 }
  0x47   : > { %413 = shalt.err (!%p410_p8)
}
  0x48   : > { %290 = dma.hbm_to_vmem [thread:$0]  (!%p643_p7), %s663_s4, 128, %s658_s28, %s111_s7  }
  0x49   : > { %132 = sbr.rel (%p654_p11) target bundleno = 412 (0x19c), region = 24  ;;  %s134_s11 = sand.u32 (!%p654_p11), 1, %s506_s23  }
  0x4a   : > { %s273_s16 = sshll.u32 (!%p654_p11), %s134_s11, 3  ;;  %s135_s17 = scalar_lea.sflag (!%p654_p11), [#allocation5], %s134_s11 }
  0x4b   : > { %s138_s18 = scalar_lea.vmem (!%p654_p11), [#allocation4], %s273_s16  ;;  %p770_p3 = scmp.ne.s32.totalorder (!%p654_p11), %s765_s8, 0 }
  0x50   : > { %481 = dma.done.wait (%p770_p3), %s135_s17, 128  }
  0x51   : > { %483 = vsyncadd (%p770_p3), %s135_s17, 4294967168  ;;  %v158_v0 = vld [vmem:[%s138_s18] sm:$0xff]  ;;  %s154_s15 = sand.u32 1, %s494_s20   ;;  %s276_s30 = sshll.u32 %s514_s0, 7 }
  0x52   : > { %159 = vmax.xlane.f32.xlu0 %v158_v0  ;;  %s274_s28 = sshll.u32 %s154_s15, 3  ;;  %s702_s27 = scalar_lea.hbm %s761_s2, %s276_s30 }
  0x53   : > { %s156_s8 = scalar_lea.vmem [#allocation7], %s274_s28  ;;  %s172_s14 = scalar_lea.sflag [#allocation6], %s154_s15 }
  0x54   : > { %s186_s4 = sshll.u32 %s156_s8, 4  ;;  %p771_p13 = scmp.ne.s32.totalorder %s766_s10, 0  ;;  %s704_s4 = int_to_ptr.vmem [resolvable:$true] %s186_s4 }
  0x55   : > { %s414_s3 = scalar_lea.vmem %s704_s4, 128  ;;  %s526_s0 = smov [#allocation7]  }
  0x56   : > { %p415_p9 = scmp.ne.s32.totalorder %s704_s4, %s414_s3  ;;  %s418_s5 = sshll.u32 %s526_s0, 4  ;;  %s419_s5 = int_to_ptr.vmem [resolvable:$false] %s418_s5 }
  0x57   : > { %s420_s6 = scalar_lea.vmem %s419_s5, 256  ;;  %p421_p11 = scmp.lt.s32.totalorder %s704_s4, %s419_s5 }
  0x58   : > { %p416_p4 = pnand %p415_p9, %p771_p13  ;;  %p422_p12 = scmp.lt.s32.totalorder %s420_s6, %s414_s3 }
  0x5a   : > { %p417_p7 = pneg %p416_p4  ;;  %p423_p1 = por %p422_p12, %p421_p11 }
  0x5c   : > { %p424_p10 = pnand %p423_p1, %p417_p7 }
  0xdf   : > { %v160_v1 = vpop.xlane.xlu0 %159 }
  0xe0   : > { %v161_v2 = vsub.f32 %v158_v0, %v160_v1 }
  0xe2   : > { %v162_v3 = vmul.f32 1.442695, %v161_v2 }
  0xe4   : > { %370 = vpow2.f32 %v162_v3 }
  0xee   : > { %v371_v4 = vpop.eup %370 }
  0xef   : > { %164 = vadd.xlane.f32.xlu0 %v371_v4 }
 0x17c   : > { %v165_v5 = vpop.xlane.xlu0 %164 }
 0x17d   : > { %372 = vlog2.f32 %v165_v5 }
 0x187   : > { %v373_v6 = vpop.eup %372 }
 0x188   : > { %v167_v7 = vmul.f32 0.6931472, %v373_v6 }
 0x18a   : > { %v168_v8 = vadd.f32 %v167_v7, %v160_v1 }
 0x18c   : > { %v169_v9 = vsub.f32 %v158_v0, %v168_v8 }
 0x18e   : > { %170 = vst [vmem:[%s156_s8] sm:$0xff] %v169_v9 }
 0x18f   : > { %427 = shalt.err (!%p424_p10)
}
 0x190   : > { %s428_s11 = scalar_lea.hbm %s702_s27, 128  ;;  %s432_s18 = scalar_lea.hbm %s761_s2, 256 }
 0x191   : > { %p429_p6 = scmp.ne.s32.totalorder %s702_s27, %s428_s11  ;;  %p433_p5 = scmp.lt.u32.totalorder %s702_s27, %s761_s2 }
 0x192   : > { %p434_p8 = scmp.lt.u32.totalorder %s432_s18, %s428_s11  ;;  %p436_p9 = scmp.lt.u32.totalorder %s428_s11, %s702_s27 }
 0x193   : > { %p430_p0 = pnand %p429_p6, %p771_p13 }
 0x194   : > { %p435_p3 = por %p434_p8, %p433_p5 }
 0x195   : > { %p431_p2 = pneg %p430_p0 }
 0x196   : > { %p437_p4 = por %p436_p9, %p435_p3 }
 0x198   : > { %p438_p7 = pnand %p437_p4, %p431_p2 }
 0x19a   : > { %441 = shalt.err (!%p438_p7)
}
 0x19b   : > { %283 = dma.vmem_to_hbm [thread:$0]  (%p771_p13), %s704_s4, 128, %s702_s27, %s172_s14  }
 0x19c PF: > { %s198_s30 = sand.u32 1, %s490_s19   ;;  %p772_p11 = scmp.ne.s32.totalorder %s767_s12, 0 }
 0x19d   : > { %p773_p12 = scmp.ge.s32.totalorder %s522_s26, 2  ;;  %s199_s8 = scalar_lea.sflag [#allocation6], %s198_s30 }
 0x19f   : > { %p292_p1 = pnand %p773_p12, %p772_p11 }
 0x1a1   : > { %485 = dma.done.wait (!%p292_p1), %s199_s8, 128  }
 0x1a2   : > { %487 = vsyncadd (!%p292_p1), %s199_s8, 4294967168  ;;  %s22_s26 = sadd.s32 1, %s522_s26   ;;  %s774_s19 = smov %s494_s20 }
 0x1a3   : > { %p19_p10 = scmp.ge.s32.totalorder %s22_s26, 4   ;;  %s775_s20 = smov %s498_s21 }
 0x1a4   : > { %s776_s21 = smov %s623_s9  ;;  %s777_s22 = smov %s506_s23 }
 0x1a5   : > { %s778_s23 = smov %s510_s24  ;;  %s779_s24 = smov %s638_s13 }
 0x1a6   : > { %s780_s0 = smov %s518_s25  ;;  %s781_s25 = smov %s783_s29 }
 0x1a7   :  { %21 = sbr.rel (!%p19_p10) target bundleno = 20 (0x14), region = 69 }
 0x1ae   :  { %204 = vsyncpa [#allocation5], 1 }
 0x1af   :  { %206 = vsyncpa [#allocation5 + $0x1], 1 }
 0x1b0   :  { %207 = vsyncpa [#allocation6], 1 }
 0x1b1   :  { %209 = vsyncpa [#allocation6 + $0x1], 1 }

</bundles_post_ra>
